<compile_context>
chip_gen: v7x
topology: tpu7x:2x2x1
jax: 0.10.0
libtpu: 0.0.40
codegen_flags: <defaults>
</compile_context>

<pallas_src>
import functools

import jax
import jax.numpy as jnp
from jax.experimental import pallas as pl
from jax.experimental.pallas import tpu as pltpu

EPS = 1e-06
NEG_SLOPE = 0.01  # both LeakyReLU() default and VNLeakyReLU negative_slope


def _round_up(x, m):
    return (x + m - 1) // m * m


def _cdiv(a, b):
    return (a + b - 1) // b


def _num_tensorcores_per_chip():
    """Best-effort trace-time query; returns 1 if unknown (v5e/v6e), 2 on v7x."""
    try:
        info = pltpu.get_tpu_info()
    except Exception:
        return 1
    for attr in ("num_cores", "num_tensorcores", "cores_per_chip", "tensorcores_per_chip"):
        v = getattr(info, attr, None)
        if isinstance(v, int) and v > 0:
            return v
    return 1


def _choose_tiling(M, tm_max=8192, min_rows_per_core=1024):
    """Pick (tm, M_pad, ngrid): large lane-dense row tiles, balanced grid steps."""
    M128 = max(_round_up(M, 128), 128)
    ngrid = max(1, _cdiv(M128, tm_max))
    cores = _num_tensorcores_per_chip()
    if cores > 1 and M128 >= cores * min_rows_per_core:
        ngrid = _round_up(ngrid, cores)      # keep both TensorCores busy on v7x
    tm = _round_up(_cdiv(M128, ngrid), 128)
    return tm, tm * ngrid, ngrid


def _gv_kernel(xin_ref, wa_ref, wb_ref, wd_ref, out_ref, *, H, V, S_out):
    """Feature-major body. xin: [3*V_in+S_in+1, tm] -> out: [S_out+3*V, tm]."""
    x = xin_ref[...]                                                           # [KA, tm]

    # --- Stage A: one stacked matmul -> inter(3H) | o_pre(3V) | sca1(S_out) | gate1(V)
    a = jnp.dot(wa_ref[...], x, preferred_element_type=jnp.float32)           # [RA, tm]
    ix, iy, iz = a[0:H], a[H:2 * H], a[2 * H:3 * H]
    base = 3 * H
    ox, oy, oz = a[base:base + V], a[base + V:base + 2 * V], a[base + 2 * V:base + 3 * V]
    sca1 = a[base + 3 * V:base + 3 * V + S_out]
    gate1 = a[base + 3 * V + S_out:]                                           # bias folded

    # --- norm of inter over xyz
    vnorm = jnp.sqrt(ix * ix + iy * iy + iz * iz)                              # [H, tm]

    # --- Stage B: one stacked matmul on vnorm -> sca2(S_out) | gate2(V)
    b = jnp.dot(wb_ref[...], vnorm, preferred_element_type=jnp.float32)        # [S_out+V, tm]
    out_sca = sca1 + b[0:S_out]                                                # [S_out, tm]
    gate = jax.nn.sigmoid(gate1 + b[S_out:])                                   # [V, tm]

    # --- gating (shared across xyz) -- per-coordinate, no sublane concats
    gx, gy, gz = gate * ox, gate * oy, gate * oz

    # --- VNLeakyReLU: d = Wd @ x per coordinate
    wd = wd_ref[...]
    dx = jnp.dot(wd, gx, preferred_element_type=jnp.float32)
    dy = jnp.dot(wd, gy, preferred_element_type=jnp.float32)
    dz = jnp.dot(wd, gz, preferred_element_type=jnp.float32)

    dotprod = gx * dx + gy * dy + gz * dz                                      # [V, tm]
    d_norm_sq = dx * dx + dy * dy + dz * dz                                    # [V, tm]
    coef = dotprod * pl.reciprocal(d_norm_sq + EPS, approx=True)
    # x_out = x - (1-slope)*(1-mask)*coef*d   (algebraically identical to the ref)
    c = (1.0 - NEG_SLOPE) * jnp.where(dotprod >= 0, 0.0, coef)                 # [V, tm]

    # --- packed, lane-dense output: [LeakyReLU(out_sca); vx; vy; vz]
    out_ref[0:S_out, :] = jnp.where(out_sca >= 0, out_sca, NEG_SLOPE * out_sca)
    out_ref[S_out:S_out + V, :] = gx - c * dx
    out_ref[S_out + V:S_out + 2 * V, :] = gy - c * dy
    out_ref[S_out + 2 * V:, :] = gz - c * dz


def prepare_gv_params(params):
    """One-time weight preparation (hoisted out of the per-call path)."""
    W1, W2, Ws, Wg, bg, Wd = [jnp.asarray(p, jnp.float32) for p in params]
    H, V_in = W1.shape                      # dim_hid, in_vector
    V_out = W2.shape[0]
    S_out = Ws.shape[0]
    S_in = Ws.shape[1] - H

    hi = jax.lax.Precision.HIGHEST          # exact folds (one-time cost)
    W21 = jnp.dot(W2, W1, precision=hi)     # [V_out, V_in]
    Ws_n, Ws_s = Ws[:, :H], Ws[:, H:]
    WgWs_s = jnp.dot(Wg, Ws_s, precision=hi)
    WgWs_n = jnp.dot(Wg, Ws_n, precision=hi)

    KA = 3 * V_in + S_in + 1                # packed input rows (+1 = ones row for bias)
    RA = 3 * H + 3 * V_out + S_out + V_out  # stacked stage-A output rows

    W_A = jnp.zeros((RA, KA), jnp.float32)
    for c in range(3):                      # block-diagonal xyz stacking
        W_A = W_A.at[c * H:(c + 1) * H, c * V_in:(c + 1) * V_in].set(W1)
        W_A = W_A.at[3 * H + c * V_out:3 * H + (c + 1) * V_out,
                     c * V_in:(c + 1) * V_in].set(W21)
    r0 = 3 * H + 3 * V_out
    W_A = W_A.at[r0:r0 + S_out, 3 * V_in:3 * V_in + S_in].set(Ws_s)
    W_A = W_A.at[r0 + S_out:, 3 * V_in:3 * V_in + S_in].set(WgWs_s)
    W_A = W_A.at[r0 + S_out:, KA - 1].set(bg)          # gate bias folded into ones column

    W_B = jnp.concatenate([Ws_n, WgWs_n], axis=0)       # [S_out + V_out, H]
    return (W_A, W_B, Wd)


def gv_perceptron_vn(sca, vec, prepared, *, tm_max=8192):
    """sca: [B, N, S_in] f32, vec: [B, N, V_in, 3] f32 -> (sca_out, vec_out)."""
    W_A, W_B, Wd = prepared
    B, N, S_in = sca.shape
    V_in = vec.shape[2]
    V_out = Wd.shape[0]
    H = W_B.shape[1]
    S_out = W_B.shape[0] - V_out
    M = B * N

    KA = 3 * V_in + S_in + 1
    RO = S_out + 3 * V_out
    tm, M_pad, ngrid = _choose_tiling(M, tm_max=tm_max)

    # ONE packed feature-major input: [vx; vy; vz; sca; ones]  (single fused XLA pass)
    sca = sca.astype(jnp.float32)
    vec = vec.astype(jnp.float32)
    vecT = vec.reshape(M, V_in, 3).transpose(2, 1, 0).reshape(3 * V_in, M)
    scaT = sca.reshape(M, S_in).T
    ones = jnp.ones((1, M), jnp.float32)
    xin = jnp.concatenate([vecT, scaT, ones], axis=0)
    if M_pad != M:
        xin = jnp.pad(xin, ((0, 0), (0, M_pad - M)))

    kernel = functools.partial(_gv_kernel, H=H, V=V_out, S_out=S_out)

    out = pl.pallas_call(
        kernel,
        out_shape=jax.ShapeDtypeStruct((RO, M_pad), jnp.float32),
        grid=(ngrid,),
        in_specs=[
            pl.BlockSpec((KA, tm), lambda i: (0, i)),
            pl.BlockSpec(W_A.shape, lambda i: (0, 0)),
            pl.BlockSpec(W_B.shape, lambda i: (0, 0)),
            pl.BlockSpec(Wd.shape, lambda i: (0, 0)),
        ],
        out_specs=pl.BlockSpec((RO, tm), lambda i: (0, i)),
        compiler_params=pltpu.CompilerParams(
            dimension_semantics=("parallel",),
            vmem_limit_bytes=32 * 1024 * 1024,
        ),
    )(xin, W_A, W_B, Wd)

    sca_out = out[:S_out, :M].T.reshape(B, N, S_out)
    vec_out = (out[S_out:, :M].reshape(3, V_out, M)
               .transpose(2, 1, 0).reshape(B, N, V_out, 3))
    return sca_out, vec_out


def reference(sca, vec, params):
    """Pure-JAX replica of the PyTorch forward pass for verification."""
    W1, W2, Ws, Wg, bg, Wd = params
    inter = jnp.einsum("hk,bnkc->bnhc", W1, vec)
    vnorm = jnp.sqrt(jnp.sum(inter * inter, axis=-1))
    cat = jnp.concatenate([vnorm, sca], axis=-1)
    out_sca = cat @ Ws.T
    out_vec = jnp.einsum("oh,bnhc->bnoc", W2, inter)
    gate = jax.nn.sigmoid(out_sca @ Wg.T + bg)[..., None]
    out_vec = gate * out_vec
    d = jnp.einsum("ok,bnkc->bnoc", Wd, out_vec)
    dotprod = jnp.sum(out_vec * d, axis=-1, keepdims=True)
    mask = (dotprod >= 0).astype(out_vec.dtype)
    d_norm_sq = jnp.sum(d * d, axis=-1, keepdims=True)
    vec_out = NEG_SLOPE * out_vec + (1 - NEG_SLOPE) * (
        mask * out_vec + (1 - mask) * (out_vec - dotprod / (d_norm_sq + EPS) * d)
    )
    sca_out = jnp.where(out_sca >= 0, out_sca, NEG_SLOPE * out_sca)
    return sca_out, vec_out


if __name__ == "__main__":
    # Module config (matches GVPerceptronVN(in_scalar, in_vector, out_scalar, out_vector))
    in_scalar, in_vector, out_scalar, out_vector = 16, 8, 16, 8
    dim_hid = max(in_vector, out_vector)
    B, N = 2, 8

    key = jax.random.PRNGKey(0)
    ks = jax.random.split(key, 8)
    W1 = jax.random.normal(ks[0], (dim_hid, in_vector), jnp.float32) * 0.2       # lin_vector
    W2 = jax.random.normal(ks[1], (out_vector, dim_hid), jnp.float32) * 0.2      # lin_vector2
    Ws = jax.random.normal(ks[2], (out_scalar, dim_hid + in_scalar), jnp.float32) * 0.2  # lin_scalar
    Wg = jax.random.normal(ks[3], (out_vector, out_scalar), jnp.float32) * 0.2   # gates W
    bg = jax.random.normal(ks[4], (out_vector,), jnp.float32) * 0.2              # gates b
    Wd = jax.random.normal(ks[5], (out_vector, out_vector), jnp.float32) * 0.2   # map_to_dir
    params = (W1, W2, Ws, Wg, bg, Wd)

    sca = jax.random.normal(ks[6], (B, N, in_scalar), jnp.float32)
    vec = jax.random.normal(ks[7], (B, N, in_vector, 3), jnp.float32)

    prepared = prepare_gv_params(params)                 # one-time weight prep (hoisted)
    fwd = jax.jit(lambda s, v: gv_perceptron_vn(s, v, prepared))

    sca_out, vec_out = fwd(sca, vec)
    jax.block_until_ready((sca_out, vec_out))

    sca_ref, vec_ref = reference(sca, vec, params)
    assert sca_out.shape == (B, N, out_scalar)
    assert vec_out.shape == (B, N, out_vector, 3)
    assert jnp.allclose(sca_out, sca_ref, atol=1e-3, rtol=1e-3)
    assert jnp.allclose(vec_out, vec_ref, atol=1e-3, rtol=1e-3)

    print("KERNEL_OK")
</pallas_src>

<mosaic_0001>
module attributes {stable_mosaic.version = 11 : i64} {
  func.func @_gv_kernel(%arg0: i32, %arg1: memref<41x128xf32, #tpu.memory_space<vmem>>, %arg2: memref<72x41xf32, #tpu.memory_space<vmem>>, %arg3: memref<24x8xf32, #tpu.memory_space<vmem>>, %arg4: memref<8x8xf32, #tpu.memory_space<vmem>>, %arg5: memref<40x128xf32, #tpu.memory_space<vmem>>) attributes {dimension_semantics = [#tpu.dimension_semantics<parallel>], iteration_bounds = array<i64: 1>, scalar_prefetch = 0 : i64, scratch_operands = 0 : i64, tpu.core_type = #tpu.core_type<tc>, window_params = [{transform_indices = @transform_0, window_bounds = array<i64: 41, 128>}, {pipeline_mode = #tpu.pipeline_mode<synchronous>, transform_indices = @transform_1, window_bounds = array<i64: 72, 41>}, {pipeline_mode = #tpu.pipeline_mode<synchronous>, transform_indices = @transform_2, window_bounds = array<i64: 24, 8>}, {pipeline_mode = #tpu.pipeline_mode<synchronous>, transform_indices = @transform_3, window_bounds = array<i64: 8, 8>}, {transform_indices = @transform_4, window_bounds = array<i64: 40, 128>}]} {
    %c0 = arith.constant 0 : index
    %c0_0 = arith.constant 0 : index
    %0 = vector.load %arg1[%c0, %c0_0] : memref<41x128xf32, #tpu.memory_space<vmem>>, vector<41x128xf32>
    %c0_1 = arith.constant 0 : index
    %c0_2 = arith.constant 0 : index
    %1 = vector.load %arg2[%c0_1, %c0_2] : memref<72x41xf32, #tpu.memory_space<vmem>>, vector<72x41xf32>
    %cst = arith.constant dense<0.000000e+00> : vector<72x128xf32>
    %2 = tpu.matmul %1, %0, %cst {dimension_numbers = #tpu.dot_dimension_numbers<[1], [0], [0], [1], [0, 0, 1, 1], [], []>} : vector<72x41xf32>, vector<41x128xf32>, vector<72x128xf32> -> vector<72x128xf32>
    %3 = vector.extract_strided_slice %2 {offsets = [0, 0], sizes = [8, 128], strides = [1, 1]} : vector<72x128xf32> to vector<8x128xf32>
    %4 = vector.extract_strided_slice %2 {offsets = [8, 0], sizes = [8, 128], strides = [1, 1]} : vector<72x128xf32> to vector<8x128xf32>
    %5 = vector.extract_strided_slice %2 {offsets = [16, 0], sizes = [8, 128], strides = [1, 1]} : vector<72x128xf32> to vector<8x128xf32>
    %6 = vector.extract_strided_slice %2 {offsets = [24, 0], sizes = [8, 128], strides = [1, 1]} : vector<72x128xf32> to vector<8x128xf32>
    %7 = vector.extract_strided_slice %2 {offsets = [32, 0], sizes = [8, 128], strides = [1, 1]} : vector<72x128xf32> to vector<8x128xf32>
    %8 = vector.extract_strided_slice %2 {offsets = [40, 0], sizes = [8, 128], strides = [1, 1]} : vector<72x128xf32> to vector<8x128xf32>
    %9 = vector.extract_strided_slice %2 {offsets = [48, 0], sizes = [16, 128], strides = [1, 1]} : vector<72x128xf32> to vector<16x128xf32>
    %10 = vector.extract_strided_slice %2 {offsets = [64, 0], sizes = [8, 128], strides = [1, 1]} : vector<72x128xf32> to vector<8x128xf32>
    %11 = arith.mulf %3, %3 : vector<8x128xf32>
    %12 = arith.mulf %4, %4 : vector<8x128xf32>
    %13 = arith.addf %11, %12 : vector<8x128xf32>
    %14 = arith.mulf %5, %5 : vector<8x128xf32>
    %15 = arith.addf %13, %14 : vector<8x128xf32>
    %16 = math.sqrt %15 : vector<8x128xf32>
    %c0_3 = arith.constant 0 : index
    %c0_4 = arith.constant 0 : index
    %17 = vector.load %arg3[%c0_3, %c0_4] : memref<24x8xf32, #tpu.memory_space<vmem>>, vector<24x8xf32>
    %cst_5 = arith.constant dense<0.000000e+00> : vector<24x128xf32>
    %18 = tpu.matmul %17, %16, %cst_5 {dimension_numbers = #tpu.dot_dimension_numbers<[1], [0], [0], [1], [0, 0, 1, 1], [], []>} : vector<24x8xf32>, vector<8x128xf32>, vector<24x128xf32> -> vector<24x128xf32>
    %19 = vector.extract_strided_slice %18 {offsets = [0, 0], sizes = [16, 128], strides = [1, 1]} : vector<24x128xf32> to vector<16x128xf32>
    %20 = arith.addf %9, %19 : vector<16x128xf32>
    %21 = vector.extract_strided_slice %18 {offsets = [16, 0], sizes = [8, 128], strides = [1, 1]} : vector<24x128xf32> to vector<8x128xf32>
    %22 = arith.addf %10, %21 : vector<8x128xf32>
    %23 = arith.negf %22 : vector<8x128xf32>
    %24 = math.exp %23 : vector<8x128xf32>
    %cst_6 = arith.constant 1.000000e+00 : f32
    %25 = vector.broadcast %cst_6 : f32 to vector<8x128xf32>
    %26 = arith.addf %25, %24 : vector<8x128xf32>
    %27 = arith.divf %25, %26 : vector<8x128xf32>
    %28 = arith.mulf %27, %6 : vector<8x128xf32>
    %29 = arith.mulf %27, %7 : vector<8x128xf32>
    %30 = arith.mulf %27, %8 : vector<8x128xf32>
    %c0_7 = arith.constant 0 : index
    %c0_8 = arith.constant 0 : index
    %31 = vector.load %arg4[%c0_7, %c0_8] : memref<8x8xf32, #tpu.memory_space<vmem>>, vector<8x8xf32>
    %cst_9 = arith.constant dense<0.000000e+00> : vector<8x128xf32>
    %32 = tpu.matmul %31, %28, %cst_9 {dimension_numbers = #tpu.dot_dimension_numbers<[1], [0], [0], [1], [0, 0, 1, 1], [], []>} : vector<8x8xf32>, vector<8x128xf32>, vector<8x128xf32> -> vector<8x128xf32>
    %cst_10 = arith.constant dense<0.000000e+00> : vector<8x128xf32>
    %33 = tpu.matmul %31, %29, %cst_10 {dimension_numbers = #tpu.dot_dimension_numbers<[1], [0], [0], [1], [0, 0, 1, 1], [], []>} : vector<8x8xf32>, vector<8x128xf32>, vector<8x128xf32> -> vector<8x128xf32>
    %cst_11 = arith.constant dense<0.000000e+00> : vector<8x128xf32>
    %34 = tpu.matmul %31, %30, %cst_11 {dimension_numbers = #tpu.dot_dimension_numbers<[1], [0], [0], [1], [0, 0, 1, 1], [], []>} : vector<8x8xf32>, vector<8x128xf32>, vector<8x128xf32> -> vector<8x128xf32>
    %35 = arith.mulf %28, %32 : vector<8x128xf32>
    %36 = arith.mulf %29, %33 : vector<8x128xf32>
    %37 = arith.addf %35, %36 : vector<8x128xf32>
    %38 = arith.mulf %30, %34 : vector<8x128xf32>
    %39 = arith.addf %37, %38 : vector<8x128xf32>
    %40 = arith.mulf %32, %32 : vector<8x128xf32>
    %41 = arith.mulf %33, %33 : vector<8x128xf32>
    %42 = arith.addf %40, %41 : vector<8x128xf32>
    %43 = arith.mulf %34, %34 : vector<8x128xf32>
    %44 = arith.addf %42, %43 : vector<8x128xf32>
    %cst_12 = arith.constant 9.99999997E-7 : f32
    %45 = vector.broadcast %cst_12 : f32 to vector<8x128xf32>
    %46 = arith.addf %44, %45 : vector<8x128xf32>
    %47 = tpu.reciprocal %46 {approx = true} : vector<8x128xf32> -> vector<8x128xf32>
    %48 = arith.mulf %39, %47 : vector<8x128xf32>
    %cst_13 = arith.constant 0.000000e+00 : f32
    %49 = vector.broadcast %cst_13 : f32 to vector<8x128xf32>
    %50 = arith.cmpf oge, %39, %49 : vector<8x128xf32>
    %cst_14 = arith.constant 0.000000e+00 : f32
    %51 = vector.broadcast %cst_14 : f32 to vector<8x128xf32>
    %52 = arith.select %50, %51, %48 : vector<8x128xi1>, vector<8x128xf32>
    %cst_15 = arith.constant 9.900000e-01 : f32
    %53 = vector.broadcast %cst_15 : f32 to vector<8x128xf32>
    %54 = arith.mulf %53, %52 : vector<8x128xf32>
    %cst_16 = arith.constant 0.000000e+00 : f32
    %55 = vector.broadcast %cst_16 : f32 to vector<16x128xf32>
    %56 = arith.cmpf oge, %20, %55 : vector<16x128xf32>
    %cst_17 = arith.constant 0.00999999977 : f32
    %57 = vector.broadcast %cst_17 : f32 to vector<16x128xf32>
    %58 = arith.mulf %57, %20 : vector<16x128xf32>
    %59 = arith.select %56, %20, %58 : vector<16x128xi1>, vector<16x128xf32>
    %c0_18 = arith.constant 0 : index
    %c0_19 = arith.constant 0 : index
    %60 = vector.load %arg5[%c0_18, %c0_19] : memref<40x128xf32, #tpu.memory_space<vmem>>, vector<16x128xf32>
    tpu.vector_store %arg5[%c0_18, %c0_19], %59 {strides = array<i32>} : memref<40x128xf32, #tpu.memory_space<vmem>>, vector<16x128xf32>,
    %61 = arith.mulf %54, %32 : vector<8x128xf32>
    %62 = arith.subf %28, %61 : vector<8x128xf32>
    %c16 = arith.constant 16 : index
    %c0_20 = arith.constant 0 : index
    %63 = vector.load %arg5[%c16, %c0_20] : memref<40x128xf32, #tpu.memory_space<vmem>>, vector<8x128xf32>
    tpu.vector_store %arg5[%c16, %c0_20], %62 {strides = array<i32>} : memref<40x128xf32, #tpu.memory_space<vmem>>, vector<8x128xf32>,
    %64 = arith.mulf %54, %33 : vector<8x128xf32>
    %65 = arith.subf %29, %64 : vector<8x128xf32>
    %c24 = arith.constant 24 : index
    %c0_21 = arith.constant 0 : index
    %66 = vector.load %arg5[%c24, %c0_21] : memref<40x128xf32, #tpu.memory_space<vmem>>, vector<8x128xf32>
    tpu.vector_store %arg5[%c24, %c0_21], %65 {strides = array<i32>} : memref<40x128xf32, #tpu.memory_space<vmem>>, vector<8x128xf32>,
    %67 = arith.mulf %54, %34 : vector<8x128xf32>
    %68 = arith.subf %30, %67 : vector<8x128xf32>
    %c32 = arith.constant 32 : index
    %c0_22 = arith.constant 0 : index
    %69 = vector.load %arg5[%c32, %c0_22] : memref<40x128xf32, #tpu.memory_space<vmem>>, vector<8x128xf32>
    tpu.vector_store %arg5[%c32, %c0_22], %68 {strides = array<i32>} : memref<40x128xf32, #tpu.memory_space<vmem>>, vector<8x128xf32>,
    return
  }
  func.func @transform_0(%arg0: i32) -> (i32, i32) {
    %c0_i32 = arith.constant 0 : i32
    %c0_i32_0 = arith.constant 0 : i32
    return %c0_i32, %arg0 : i32, i32
  }
  func.func @transform_1(%arg0: i32) -> (i32, i32) {
    %c0_i32 = arith.constant 0 : i32
    %c0_i32_0 = arith.constant 0 : i32
    %c0_i32_1 = arith.constant 0 : i32
    return %c0_i32, %c0_i32_0 : i32, i32
  }
  func.func @transform_2(%arg0: i32) -> (i32, i32) {
    %c0_i32 = arith.constant 0 : i32
    %c0_i32_0 = arith.constant 0 : i32
    %c0_i32_1 = arith.constant 0 : i32
    return %c0_i32, %c0_i32_0 : i32, i32
  }
  func.func @transform_3(%arg0: i32) -> (i32, i32) {
    %c0_i32 = arith.constant 0 : i32
    %c0_i32_0 = arith.constant 0 : i32
    %c0_i32_1 = arith.constant 0 : i32
    return %c0_i32, %c0_i32_0 : i32, i32
  }
  func.func @transform_4(%arg0: i32) -> (i32, i32) {
    %c0_i32 = arith.constant 0 : i32
    %c0_i32_0 = arith.constant 0 : i32
    return %c0_i32, %arg0 : i32, i32
  }
}

</mosaic_0001>

<bundles_post_ra>
// kernel: _lambda_.1
= control target key start
LH: loop header
LB: loop body
LE: loop exit
PB: predicated region body
PF: predicated region fallthrough
CT: control target
= control target key end

     0   :  { %v680_v0 = vmov 0.0|0.0   ;;  %vm681_vm0 = vmmov 0   ;;  %v682_v6 = vmov 0.0   ;;  %vm60_vm1 = vcmask 1040384   ;;  %s830_s0 = inlined_call_operand.vmem [shape: f32[41,128], index: 0, kind: input, shape index: {}]   ;;  %s831_s1 = inlined_call_operand.vmem [shape: f32[72,41], index: 1, kind: input, shape index: {}]   ;;  %s832_s2 = inlined_call_operand.vmem [shape: f32[24,8], index: 2, kind: input, shape index: {}]   ;;  %s833_s4 = inlined_call_operand.vmem [shape: f32[40,128], index: 4, kind: output, shape index: {}]   ;;  %s834_s3 = inlined_call_operand.vmem [shape: f32[8,8], index: 3, kind: input, shape index: {}]  }
   0x1   :  { %649 = vmatprep.subr.bf16.mxu0 %v680_v0  ;;  %v17_v1 = vld [vmem:[%s830_s0] sm:$0xff]  ;;  %v18_v2 = vld [vmem:[%s830_s0 + $0x8] sm:$0xff]  ;;  %v19_v3 = vld [vmem:[%s830_s0 + $0x10] sm:$0xff]  ;;  %659 = vmatprep.subr.bf16.mxu1 %v680_v0  ;;  %vm683_vm2 = vmmov 1   ;;  %vm32_vm4 = vcmask 334848   ;;  %vm189_vm7 = vcmask 64512  }
   0x2   :  { %v650_v4 = vpack.c.bf16 %v18_v2, %v17_v1  ;;  %v20_v5 = vld [vmem:[%s830_s0 + $0x18] sm:$0xff]  ;;  %596 = vmatprep.mubr.msk.f32.mxu0 %vm681_vm0, %v682_v6  ;;  %611 = vmatprep.mubr.msk.f32.mxu1 %vm681_vm0, %v682_v6  ;;  %v21_v8 = vld [vmem:[%s830_s0 + $0x20] sm:$0xff]  ;;  %v22_v9 = vld [vmem:[%s830_s0 + $0x28] sm:$0x1] }
   0x3   :  { %v653_v7 = vpack.c.bf16 %v20_v5, %v19_v3  ;;  %v656_v10 = vpack.c.bf16 %v22_v9, %v21_v8  ;;  %vm657_vm3 = vmpackc.low %vm60_vm1, %vm683_vm2  ;;  %v23_v11 = vld [vmem:[%s831_s1] sm:$0xff]  ;;  %v24_v12 = vld [vmem:[%s831_s1 + $0x8] sm:$0xff] }
   0x4   :  { %651 = vmatpush3.bf16.msra.mxu0 %v650_v4  ;;  %662 = vmatpush3.bf16.msra.mxu1 %v650_v4  ;;  %v25_v13 = vld [vmem:[%s831_s1 + $0x10] sm:$0xff]  ;;  %v26_v14 = vld [vmem:[%s831_s1 + $0x18] sm:$0xff]  ;;  %v28_v15 = vld [vmem:[%s831_s1 + $0x28] sm:$0xff] }
   0x5   :  { %652 = vmatprep.subr.bf16.mxu0 %v680_v0  ;;  %660 = vmatprep.subr.bf16.mxu1 %v680_v0  ;;  %v27_v16 = vld [vmem:[%s831_s1 + $0x20] sm:$0xff]  ;;  %v29_v17 = vld [vmem:[%s831_s1 + $0x30] sm:$0xff]  ;;  %v30_v18 = vld [vmem:[%s831_s1 + $0x38] sm:$0xff] }
   0x6   :  { %v31_v19 = vld [vmem:[%s831_s1 + $0x40] sm:$0xff]  ;;  %v187_v37 = vld [vmem:[%s832_s2 + $0x8] sm:$0xff]  ;;  %v188_v38 = vld [vmem:[%s832_s2 + $0x10] sm:$0xff] }
   0x7   :  { %v186_v35 = vld [vmem:[%s832_s2] sm:$0xff] }
   0x8   :  { %654 = vmatpush3.bf16.msra.mxu0 %v653_v7  ;;  %663 = vmatpush3.bf16.msra.mxu1 %v653_v7  ;;  %v291_v5 = vld [vmem:[%s834_s3] sm:$0xff] }
   0x9   :  { %655 = vmatprep.subr.bf16.mxu0 %v680_v0  ;;  %661 = vmatprep.subr.bf16.mxu1 %v680_v0 }
   0xc   :  { %658 = vmatpush3.bf16.msk.msra.mxu0 %vm657_vm3, %v656_v10  ;;  %664 = vmatpush3.bf16.msk.msra.mxu1 %vm657_vm3, %v656_v10 }
   0xd   :  { %623 = vmatprep.subr.mxu0 %v682_v6  ;;  %634 = vmatprep.subr.mxu1 %v682_v6 }
   0xf   :  { %597 = vmatmul.mubr.msk.f32.vlgmr.msra.gmra.mrb[0].mxu0 %vm32_vm4, %v23_v11  ;;  %612 = vmatmul.mubr.msk.f32.vlgmr.msra.gmra.mrb[0].mxu1 %vm32_vm4, %v28_v15 }
  0x10   :  { %599 = vmatprep.mubr.msk.f32.mxu0 %vm681_vm0, %v682_v6  ;;  %614 = vmatprep.mubr.msk.f32.mxu1 %vm681_vm0, %v682_v6 }
  0x13   :  { %600 = vmatmul.mubr.msk.f32.gmra.mrb[2].mxu0 %vm32_vm4, %v24_v12  ;;  %615 = vmatmul.mubr.msk.f32.gmra.mrb[2].mxu1 %vm32_vm4, %v29_v17 }
  0x14   :  { %602 = vmatprep.mubr.msk.f32.mxu0 %vm681_vm0, %v682_v6  ;;  %617 = vmatprep.mubr.msk.f32.mxu1 %vm681_vm0, %v682_v6 }
  0x17   :  { %603 = vmatmul.mubr.msk.f32.gmra.mrb[4].mxu0 %vm32_vm4, %v25_v13  ;;  %618 = vmatmul.mubr.msk.f32.gmra.mrb[4].mxu1 %vm32_vm4, %v30_v18 }
  0x18   :  { %605 = vmatprep.mubr.msk.f32.mxu0 %vm681_vm0, %v682_v6  ;;  %620 = vmatprep.mubr.msk.f32.mxu1 %vm681_vm0, %v682_v6 }
  0x1b   :  { %606 = vmatmul.mubr.msk.f32.gmra.mrb[6].mxu0 %vm32_vm4, %v26_v14  ;;  %621 = vmatmul.mubr.msk.f32.gmra.mrb[6].mxu1 %vm32_vm4, %v31_v19 }
  0x1c   :  { %608 = vmatprep.mubr.msk.f32.mxu0 %vm681_vm0, %v682_v6  ;;  %636 = vmatprep.mubr.msk.f32.mxu1 %vm681_vm0, %v682_v6 }
  0x1f   :  { %609 = vmatmul.mubr.msk.f32.gmra.mrb[8].mxu0 %vm32_vm4, %v27_v16 }
  0x20   :  { %625 = vmatprep.mubr.msk.f32.mxu0 %vm681_vm0, %v682_v6 }
  0xe2   :  { %v130_v20 = vpop.f32.mrb[0].mxu0  ;;  %v155_v40 = vpop.f32.mrb[0].mxu1 }
  0xe3   :  { %v598_v21 = vpop.f32.mrb[1].mxu0  ;;  %v174_v23 = vmul.f32 %v130_v20, %v130_v20  ;;  %v613_v42 = vpop.f32.mrb[1].mxu1 }
  0xe6   :  { %v135_v22 = vpop.f32.mrb[2].mxu0  ;;  %v160_v45 = vpop.f32.mrb[2].mxu1 }
  0xe7   :  { %v175_v24 = vmul.f32 %v135_v22, %v135_v22  ;;  %v601_v25 = vpop.f32.mrb[3].mxu0  ;;  %v616_v46 = vpop.f32.mrb[3].mxu1 }
  0xe9   :  { %v176_v26 = vadd.f32 %v175_v24, %v174_v23 }
  0xea   :  { %v140_v27 = vpop.f32.mrb[4].mxu0  ;;  %v165_v47 = vpop.f32.mrb[4].mxu1 }
  0xeb   :  { %v177_v28 = vmul.f32 %v140_v27, %v140_v27  ;;  %v604_v29 = vpop.f32.mrb[5].mxu0  ;;  %v619_v48 = vpop.f32.mrb[5].mxu1 }
  0xed   :  { %v178_v30 = vadd.f32 %v177_v28, %v176_v26 }
  0xee   :  { %v145_v39 = vpop.f32.mrb[6].mxu0  ;;  %v170_v49 = vpop.f32.mrb[6].mxu1 }
  0xef   :  { %672 = vrsqrt.f32 %v178_v30  ;;  %vm181_vm5 = vcmp.eq.f32.partialorder %v178_v30, inf  ;;  %v184_v33 = vand.u32 2147483648, %v178_v30  ;;  %vm183_vm6 = vcmp.eq.f32.partialorder %v178_v30, 0.0  ;;  %v607_v41 = vpop.f32.mrb[7].mxu0  ;;  %v622_v50 = vpop.f32.mrb[7].mxu1 }
  0xf2   :  { %v150_v43 = vpop.f32.mrb[8].mxu0 }
  0xf3   :  { %v610_v44 = vpop.f32.mrb[9].mxu0 }
  0xf9   :  { %v673_v31 = vpop.eup %672 }
  0xfa   :  { %v180_v32 = vmul.f32 %v673_v31, %v178_v30 }
  0xfc   :  { %v182_v34 = vsel %vm181_vm5, %v178_v30, %v180_v32 }
  0xfd   :  { %v185_v36 = vsel %vm183_vm6, %v184_v33, %v182_v34 }
  0xfe   :  { %624 = vmatpush3.msra.mxu0 %v185_v36 }
  0xff   :  { %626 = vmatmul.mubr.msk.f32.vlgmr.msra.gmra.mrb[10].mxu0 %vm189_vm7, %v186_v35 }
 0x100   :  { %628 = vmatprep.mubr.msk.f32.mxu0 %vm681_vm0, %v682_v6 }
 0x103   :  { %629 = vmatmul.mubr.msk.f32.gmra.mrb[12].mxu0 %vm189_vm7, %v187_v37 }
 0x104   :  { %631 = vmatprep.mubr.msk.f32.mxu0 %vm681_vm0, %v682_v6 }
 0x107   :  { %632 = vmatmul.mubr.msk.f32.gmra.mrb[14].mxu0 %vm189_vm7, %v188_v38 }
 0x1d2   :  { %v265_v51 = vpop.f32.mrb[10].mxu0 }
 0x1d3   :  { %v279_v52 = vadd.f32 %v265_v51, %v160_v45  ;;  %v627_v53 = vpop.f32.mrb[11].mxu0 }
 0x1d5   :  { %vm521_vm8 = vcmp.ge.f32.partialorder %v279_v52, 0.0  ;;  %v523_v54 = vmul.f32 0.01, %v279_v52 }
 0x1d6   :  { %v270_v55 = vpop.f32.mrb[12].mxu0 }
 0x1d7   :  { %v525_v56 = vsel %vm521_vm8, %v279_v52, %v523_v54  ;;  %v280_v57 = vadd.f32 %v270_v55, %v165_v47  ;;  %v630_v58 = vpop.f32.mrb[13].mxu0 }
 0x1d8   :  { %527 = vst [vmem:[%s833_s4] sm:$0xff] %v525_v56 }
 0x1d9   :  { %vm522_vm9 = vcmp.ge.f32.partialorder %v280_v57, 0.0  ;;  %v524_v59 = vmul.f32 0.01, %v280_v57 }
 0x1da   :  { %v275_v60 = vpop.f32.mrb[14].mxu0 }
 0x1db   :  { %v526_v61 = vsel %vm522_vm9, %v280_v57, %v524_v59  ;;  %v281_v62 = vadd.f32 %v275_v60, %v170_v49  ;;  %v633_v63 = vpop.f32.mrb[15].mxu0 }
 0x1dc   :  { %528 = vst [vmem:[%s833_s4 + $0x8] sm:$0xff] %v526_v61 }
 0x1dd   :  { %v555_v0 = vmul.f32 -1.442695, %v281_v62 }
 0x1df   :  { %674 = vpow2.f32 %v555_v0 }
 0x1e9   :  { %v675_v1 = vpop.eup %674 }
 0x1ea   :  { %v285_v2 = vadd.f32 1.0, %v675_v1 }
 0x1ec   :  { %676 = vrcp.f32 %v285_v2 }
 0x1f6   :  { %v677_v3 = vpop.eup %676 }
 0x1f7   :  { %v288_v4 = vmul.f32 %v677_v3, %v145_v39  ;;  %v289_v7 = vmul.f32 %v677_v3, %v150_v43  ;;  %v290_v8 = vmul.f32 %v677_v3, %v155_v40 }
 0x1f9   :  { %635 = vmatpush3.msra.mxu1 %v288_v4 }
 0x1fa   :  { %637 = vmatmul.mubr.msk.f32.vlgmr.msra.gmra.mrb[8].mxu1 %vm189_vm7, %v291_v5  ;;  %639 = vmatprep.subr.mxu1 %v682_v6 }
 0x1fb   :  { %640 = vmatpush3.msra.mxu1 %v289_v7  ;;  %641 = vmatprep.mubr.msk.f32.mxu1 %vm681_vm0, %v682_v6 }
 0x1fc   :  { %644 = vmatprep.subr.mxu1 %v682_v6 }
 0x1fe   :  { %642 = vmatmul.mubr.msk.f32.vlgmr.msra.gmra.mrb[10].mxu1 %vm189_vm7, %v291_v5 }
 0x1ff   :  { %645 = vmatpush3.msra.mxu1 %v290_v8  ;;  %646 = vmatprep.mubr.msk.f32.mxu1 %vm681_vm0, %v682_v6 }
 0x202   :  { %647 = vmatmul.mubr.msk.f32.vlgmr.msra.gmra.mrb[12].mxu1 %vm189_vm7, %v291_v5 }
 0x2cd   :  { %v361_v9 = vpop.f32.mrb[8].mxu1 }
 0x2ce   :  { %v638_v10 = vpop.f32.mrb[9].mxu1  ;;  %v505_v12 = vmul.f32 %v361_v9, %v288_v4  ;;  %v510_v13 = vmul.f32 %v361_v9, %v361_v9 }
 0x2d1   :  { %v431_v11 = vpop.f32.mrb[10].mxu1 }
 0x2d2   :  { %v506_v14 = vmul.f32 %v431_v11, %v289_v7  ;;  %v511_v15 = vmul.f32 %v431_v11, %v431_v11  ;;  %v643_v16 = vpop.f32.mrb[11].mxu1 }
 0x2d4   :  { %v507_v17 = vadd.f32 %v506_v14, %v505_v12  ;;  %v512_v18 = vadd.f32 %v511_v15, %v510_v13 }
 0x2d5   :  { %v501_v19 = vpop.f32.mrb[12].mxu1 }
 0x2d6   :  { %v508_v20 = vmul.f32 %v501_v19, %v290_v8  ;;  %v513_v21 = vmul.f32 %v501_v19, %v501_v19  ;;  %v648_v22 = vpop.f32.mrb[13].mxu1 }
 0x2d8   :  { %v509_v23 = vadd.f32 %v508_v20, %v507_v17  ;;  %v514_v24 = vadd.f32 %v513_v21, %v512_v18 }
 0x2da   :  { %v515_v25 = vadd.f32 1e-06, %v514_v24  ;;  %vm518_vm10 = vcmp.ge.f32.partialorder %v509_v23, 0.0 }
 0x2dc   :  { %678 = vrcp.f32 %v515_v25 }
 0x2e6   :  { %v679_v6 = vpop.eup %678 }
 0x2e7   :  { %v517_v26 = vmul.f32 %v679_v6, %v509_v23 }
 0x2e9   :  { %v519_v27 = vsel %vm518_vm10, 0.0, %v517_v26 }
 0x2ea   :  { %v520_v28 = vmul.f32 0.99, %v519_v27 }
 0x2ec   :  { %v529_v29 = vmul.f32 %v520_v28, %v361_v9  ;;  %v532_v30 = vmul.f32 %v520_v28, %v431_v11  ;;  %v535_v31 = vmul.f32 %v520_v28, %v501_v19 }
 0x2ee   :  { %v530_v32 = vsub.f32 %v288_v4, %v529_v29  ;;  %v533_v33 = vsub.f32 %v289_v7, %v532_v30  ;;  %v536_v34 = vsub.f32 %v290_v8, %v535_v31 }
 0x2f0   :  { %531 = vst [vmem:[%s833_s4 + $0x10] sm:$0xff] %v530_v32  ;;  %534 = vst [vmem:[%s833_s4 + $0x18] sm:$0xff] %v533_v33 }
 0x2f1   :  { %537 = vst [vmem:[%s833_s4 + $0x20] sm:$0xff] %v536_v34 }

</bundles_post_ra>
